<compile_context>
chip_gen: v7x
topology: tpu7x:2x2x1
jax: 0.10.0
libtpu: 0.0.40
codegen_flags: <defaults>
</compile_context>

<pallas_src>
import math

import jax
import jax.numpy as jnp
from jax.experimental import pallas as pl
from jax.experimental.pallas import tpu as pltpu


_LOG_SQRT_2PI = 0.5 * math.log(2.0 * math.pi)
_LANES = 128


def _make_count_sum_kernel(rows_total, bt, rt, needs_row_mask, use_mxu):
    """Streaming reduction kernel: per-sample partial sum(p) / sum(p*p).

    Accumulates into resident (bt, S, 128) float32 output blocks, where S = 8
    (vreg-aligned sublane partials) on the VPU path and S = 1 on the MXU path.
    The ragged tail along the reduction axis is masked only on the final step.
    """

    def kernel(p_ref, *rest):
        if use_mxu:
            ones_ref, mu_ref, p2_ref = rest
        else:
            mu_ref, p2_ref = rest

        k = pl.program_id(1)
        kt = pl.num_programs(1)

        @pl.when(k == 0)
        def _init():
            mu_ref[...] = jnp.zeros_like(mu_ref)
            p2_ref[...] = jnp.zeros_like(p2_ref)

        def _load(masked):
            x = p_ref[...]                         # (bt, rt, 128), original dtype
            if not use_mxu:
                x = x.astype(jnp.float32)          # VPU path accumulates in f32
            if masked:
                row = jax.lax.broadcasted_iota(jnp.int32, x.shape, 1)
                valid = (k * rt + row) < rows_total
                x = jnp.where(valid, x, jnp.zeros_like(x))
            return x

        def _accumulate(x):
            if use_mxu:
                # Row-sums pushed to the (otherwise idle) MXU: ones(1,rt) @ x
                # with f32 accumulation.  x*x stays in the input dtype (bf16) to
                # avoid the unpack/cast in the hot loop (small precision trade).
                ones = ones_ref[...]                               # (1, rt)
                xx = x * x
                for b in range(bt):                                # static unroll
                    mu_ref[b, :, :] += jnp.dot(
                        ones, x[b], preferred_element_type=jnp.float32)
                    p2_ref[b, :, :] += jnp.dot(
                        ones, xx[b], preferred_element_type=jnp.float32)
            elif rt % 8 == 0:
                # Pure elementwise vadds: collapse rt in groups of 8 sublanes so
                # partials stay vreg-shaped; no cross-sublane XLU work here.
                x4 = x.reshape(bt, rt // 8, 8, _LANES)
                mu_ref[...] += jnp.sum(x4, axis=1)
                p2_ref[...] += jnp.sum(x4 * x4, axis=1)
            else:
                # Tiny full-dim block (rt == R, fewer than 8 rows): plain reduce.
                mu_ref[...] += jnp.sum(x, axis=1, keepdims=True)
                p2_ref[...] += jnp.sum(x * x, axis=1, keepdims=True)

        if needs_row_mask:
            # Pay the iota/compare/select only on the ragged final step.
            @pl.when(k != kt - 1)
            def _bulk():
                _accumulate(_load(masked=False))

            @pl.when(k == kt - 1)
            def _tail():
                _accumulate(_load(masked=True))
        else:
            _accumulate(_load(masked=False))

    return kernel


def count_loss(prob_map, true_count, eps=1e-6,
               vmem_tile_budget_bytes=8 << 20, use_mxu="auto"):
    """DECODE count loss (mean over batch), computed with a Pallas TPU kernel.

    prob_map:   (B, 1, H, W) post-sigmoid probabilities, any float dtype
                (streamed through the kernel in its original dtype).
    true_count: (B,) ground-truth emitter counts (int or float).
    Returns the scalar float32 loss.
    """
    B = prob_map.shape[0]
    p = prob_map.reshape(B, -1)                    # free view, original dtype
    N = p.shape[1]

    pad = (-N) % _LANES
    if pad:
        # Rare fallback (N not a multiple of 128): zero columns contribute 0 to
        # both sum(p) and sum(p*p), so the loss is unchanged.
        p = jnp.pad(p, ((0, 0), (0, pad)))
    R = p.shape[1] // _LANES
    p = p.reshape(B, R, _LANES)                    # lane-dense, contiguous

    esize = p.dtype.itemsize
    # Rows (bt * rt) per (double-buffered) input block; floor = one (8,128) tile.
    per_buf = max(8 * _LANES * esize, vmem_tile_budget_bytes // 2)
    max_rows = max(8, (per_buf // (_LANES * esize)) // 8 * 8)

    if R >= max_rows:
        # Large per-sample reduction: stream one sample per batch grid step.
        bt, rt = 1, max_rows
    else:
        # Whole per-sample reduction fits in one block: tile over the batch so
        # blocks stay near the budget (bt is budget-derived, never floored up).
        rt = R
        bt = max(1, min(B, max_rows // max(R, 1)))
    nb = pl.cdiv(B, bt)
    n_tiles = pl.cdiv(R, rt)
    needs_row_mask = (R % rt) != 0

    if use_mxu == "auto":
        # MXU offload pays when bf16 streaming would saturate the VALU slot
        # (v7x, marginally v6e); it is neutral for f32 (already HBM-bound).
        use_mxu = (p.dtype == jnp.bfloat16) and rt >= 8 and bt <= 8
    use_mxu = bool(use_mxu)

    acc_sub = 1 if use_mxu else (8 if rt % 8 == 0 else 1)
    b_rows = nb * bt                               # padded output rows (>= B)

    in_specs = [pl.BlockSpec((bt, rt, _LANES), lambda b, k: (b, k, 0))]
    args = [p]
    if use_mxu:
        ones = jnp.ones((1, rt), dtype=p.dtype)
        in_specs.append(pl.BlockSpec((1, rt), lambda b, k: (0, 0)))  # resident
        args.append(ones)

    out_shape = (
        jax.ShapeDtypeStruct((b_rows, acc_sub, _LANES), jnp.float32),  # sum p
        jax.ShapeDtypeStruct((b_rows, acc_sub, _LANES), jnp.float32),  # sum p*p
    )
    out_spec = pl.BlockSpec((bt, acc_sub, _LANES), lambda b, k: (b, 0, 0))

    # Explicit scoped-VMEM limit: double-buffered input (+ resident ones) plus
    # resident output partials, with headroom, capped at 32 MiB (fits v7x's
    # 64 MiB physical VMEM; a no-op relaxation on v5e/v6e's 128 MiB).
    need = (2 * bt * rt * _LANES * esize
            + (2 * rt * esize if use_mxu else 0)
            + 2 * 2 * bt * acc_sub * _LANES * 4
            + (1 << 20))
    vmem_limit = int(min(32 << 20, max(16 << 20, 2 * need)))

    out_mu, out_p2 = pl.pallas_call(
        _make_count_sum_kernel(R, bt, rt, needs_row_mask, use_mxu),
        out_shape=out_shape,
        grid_spec=pltpu.PrefetchScalarGridSpec(
            num_scalar_prefetch=0,
            grid=(nb, n_tiles),                    # reduction axis last
            in_specs=in_specs,
            out_specs=[out_spec, out_spec],
        ),
        compiler_params=pltpu.CompilerParams(
            dimension_semantics=("parallel", "arbitrary"),
            vmem_limit_bytes=vmem_limit,
        ),
    )(*args)

    # O(B) epilogue in JAX: collapse partials, Gaussian log-likelihood, mean.
    mu = out_mu[:B].reshape(B, -1).sum(axis=1)
    sum_p2 = out_p2[:B].reshape(B, -1).sum(axis=1)
    var = mu - sum_p2 + eps                        # == sum p*(1-p) + eps
    tc = true_count.astype(jnp.float32)
    term1 = 0.5 * (tc - mu) ** 2 / var
    term2 = 0.5 * jnp.log(var) + _LOG_SQRT_2PI
    return jnp.mean(term1 + term2)


def _reference(prob_map, true_count, eps=1e-6):
    B = prob_map.shape[0]
    p = prob_map.reshape(B, -1).astype(jnp.float32)
    mu = p.sum(axis=1)
    var = (p * (1.0 - p)).sum(axis=1) + eps
    term1 = 0.5 * (true_count.astype(jnp.float32) - mu) ** 2 / var
    term2 = jnp.log(jnp.sqrt(var) * math.sqrt(2.0 * math.pi))
    return jnp.mean(term1 + term2)


if __name__ == "__main__":
    key = jax.random.PRNGKey(0)
    k1, k2, k3 = jax.random.split(key, 3)

    # --- 1) Small f32 map (B=2, 1, 16, 16): single-block VPU path.
    B, H, W = 2, 16, 16
    prob_map = jax.nn.sigmoid(jax.random.normal(k1, (B, 1, H, W), jnp.float32))
    true_count = jax.random.randint(k2, (B,), 0, 10).astype(jnp.int32)
    loss = jax.block_until_ready(count_loss(prob_map, true_count))
    ref = _reference(prob_map, true_count)
    assert jnp.allclose(loss, ref, rtol=1e-4, atol=1e-4), ("f32 small", loss, ref)

    # --- 2) Same map in bf16 (tiny per-sample reduction -> VPU path, f32 acc).
    pm_bf16 = prob_map.astype(jnp.bfloat16)
    loss = jax.block_until_ready(count_loss(pm_bf16, true_count))
    ref = _reference(pm_bf16, true_count)
    assert jnp.allclose(loss, ref, rtol=2e-2, atol=2e-2), ("bf16 small", loss, ref)

    # --- 3) f32, forced multi-tile reduction with a ragged masked tail
    #        (vreg-aligned accumulation, parallel batch axis).
    B2, H2, W2 = 2, 48, 48
    pm2 = jax.nn.sigmoid(jax.random.normal(k3, (B2, 1, H2, W2), jnp.float32))
    tc2 = jnp.array([3, 7], dtype=jnp.int32)
    loss = jax.block_until_ready(
        count_loss(pm2, tc2, vmem_tile_budget_bytes=16 * 1024))
    ref = _reference(pm2, tc2)
    assert jnp.allclose(loss, ref, rtol=1e-4, atol=1e-4), ("f32 tiled", loss, ref)

    # --- 4) bf16, forced multi-tile -> exercises the MXU row-sum path + mask.
    pm2_bf16 = pm2.astype(jnp.bfloat16)
    loss = jax.block_until_ready(
        count_loss(pm2_bf16, tc2, vmem_tile_budget_bytes=8 * 1024))
    ref = _reference(pm2_bf16, tc2)
    assert jnp.allclose(loss, ref, rtol=2e-2, atol=2e-2), ("bf16 mxu", loss, ref)

    # --- 5) H*W not a multiple of 128 (column-pad fallback), B=3.
    B3, H3, W3 = 3, 10, 10
    pm3 = jax.nn.sigmoid(jax.random.normal(k2, (B3, 1, H3, W3), jnp.float32))
    tc3 = jnp.array([1, 4, 9], dtype=jnp.int32)
    loss = jax.block_until_ready(count_loss(pm3, tc3))
    ref = _reference(pm3, tc3)
    assert jnp.allclose(loss, ref, rtol=1e-4, atol=1e-4), ("f32 padded", loss, ref)

    print("KERNEL_OK")
</pallas_src>

<mosaic_0001>
module attributes {stable_mosaic.version = 11 : i64} {
  func.func @kernel(%arg0: i32, %arg1: i32, %arg2: memref<2x2x128xf32, #tpu.memory_space<vmem>>, %arg3: memref<2x1x128xf32, #tpu.memory_space<vmem>>, %arg4: memref<2x1x128xf32, #tpu.memory_space<vmem>>) attributes {dimension_semantics = [#tpu.dimension_semantics<parallel>, #tpu.dimension_semantics<arbitrary>], iteration_bounds = array<i64: 1, 1>, scalar_prefetch = 0 : i64, scratch_operands = 0 : i64, tpu.core_type = #tpu.core_type<tc>, window_params = [{transform_indices = @transform_0, window_bounds = array<i64: 2, 2, 128>}, {transform_indices = @transform_1, window_bounds = array<i64: 2, 1, 128>}, {transform_indices = @transform_2, window_bounds = array<i64: 2, 1, 128>}]} {
    %c0_i32 = arith.constant 0 : i32
    %0 = arith.cmpi eq, %arg1, %c0_i32 : i32
    %1 = arith.extui %0 : i1 to i32
    %c0_i32_0 = arith.constant 0 : i32
    %2 = arith.cmpi ne, %1, %c0_i32_0 : i32
    scf.if %2 {
      %cst_16 = arith.constant 0.000000e+00 : f32
      %15 = vector.broadcast %cst_16 : f32 to vector<2x1x128xf32>
      %c0_17 = arith.constant 0 : index
      %c0_18 = arith.constant 0 : index
      %c0_19 = arith.constant 0 : index
      %16 = vector.load %arg3[%c0_17, %c0_18, %c0_19] : memref<2x1x128xf32, #tpu.memory_space<vmem>>, vector<2x1x128xf32>
      tpu.vector_store %arg3[%c0_17, %c0_18, %c0_19], %15 {strides = array<i32>} : memref<2x1x128xf32, #tpu.memory_space<vmem>>, vector<2x1x128xf32>,
      %cst_20 = arith.constant 0.000000e+00 : f32
      %17 = vector.broadcast %cst_20 : f32 to vector<2x1x128xf32>
      %c0_21 = arith.constant 0 : index
      %c0_22 = arith.constant 0 : index
      %c0_23 = arith.constant 0 : index
      %18 = vector.load %arg4[%c0_21, %c0_22, %c0_23] : memref<2x1x128xf32, #tpu.memory_space<vmem>>, vector<2x1x128xf32>
      tpu.vector_store %arg4[%c0_21, %c0_22, %c0_23], %17 {strides = array<i32>} : memref<2x1x128xf32, #tpu.memory_space<vmem>>, vector<2x1x128xf32>,
    } else {
    }
    %c0 = arith.constant 0 : index
    %c0_1 = arith.constant 0 : index
    %c0_2 = arith.constant 0 : index
    %3 = vector.load %arg2[%c0, %c0_1, %c0_2] : memref<2x2x128xf32, #tpu.memory_space<vmem>>, vector<2x2x128xf32>
    %c0_3 = arith.constant 0 : index
    %c0_4 = arith.constant 0 : index
    %c0_5 = arith.constant 0 : index
    %4 = vector.load %arg3[%c0_3, %c0_4, %c0_5] : memref<2x1x128xf32, #tpu.memory_space<vmem>>, vector<2x1x128xf32>
    %cst = arith.constant dense<0.000000e+00> : vector<2x128xf32>
    %5 = vector.multi_reduction <add>, %3, %cst [1] : vector<2x2x128xf32> to vector<2x128xf32>
    %6 = vector.shape_cast %5 : vector<2x128xf32> to vector<2x1x128xf32>
    %7 = arith.addf %4, %6 : vector<2x1x128xf32>
    %c0_6 = arith.constant 0 : index
    %c0_7 = arith.constant 0 : index
    %c0_8 = arith.constant 0 : index
    %8 = vector.load %arg3[%c0_6, %c0_7, %c0_8] : memref<2x1x128xf32, #tpu.memory_space<vmem>>, vector<2x1x128xf32>
    tpu.vector_store %arg3[%c0_6, %c0_7, %c0_8], %7 {strides = array<i32>} : memref<2x1x128xf32, #tpu.memory_space<vmem>>, vector<2x1x128xf32>,
    %c0_9 = arith.constant 0 : index
    %c0_10 = arith.constant 0 : index
    %c0_11 = arith.constant 0 : index
    %9 = vector.load %arg4[%c0_9, %c0_10, %c0_11] : memref<2x1x128xf32, #tpu.memory_space<vmem>>, vector<2x1x128xf32>
    %10 = arith.mulf %3, %3 : vector<2x2x128xf32>
    %cst_12 = arith.constant dense<0.000000e+00> : vector<2x128xf32>
    %11 = vector.multi_reduction <add>, %10, %cst_12 [1] : vector<2x2x128xf32> to vector<2x128xf32>
    %12 = vector.shape_cast %11 : vector<2x128xf32> to vector<2x1x128xf32>
    %13 = arith.addf %9, %12 : vector<2x1x128xf32>
    %c0_13 = arith.constant 0 : index
    %c0_14 = arith.constant 0 : index
    %c0_15 = arith.constant 0 : index
    %14 = vector.load %arg4[%c0_13, %c0_14, %c0_15] : memref<2x1x128xf32, #tpu.memory_space<vmem>>, vector<2x1x128xf32>
    tpu.vector_store %arg4[%c0_13, %c0_14, %c0_15], %13 {strides = array<i32>} : memref<2x1x128xf32, #tpu.memory_space<vmem>>, vector<2x1x128xf32>,
    return
  }
  func.func @transform_0(%arg0: i32, %arg1: i32) -> (i32, i32, i32) {
    %c0_i32 = arith.constant 0 : i32
    %c0_i32_0 = arith.constant 0 : i32
    return %arg0, %arg1, %c0_i32 : i32, i32, i32
  }
  func.func @transform_1(%arg0: i32, %arg1: i32) -> (i32, i32, i32) {
    %c0_i32 = arith.constant 0 : i32
    %c0_i32_0 = arith.constant 0 : i32
    %c0_i32_1 = arith.constant 0 : i32
    return %arg0, %c0_i32, %c0_i32_0 : i32, i32, i32
  }
  func.func @transform_2(%arg0: i32, %arg1: i32) -> (i32, i32, i32) {
    %c0_i32 = arith.constant 0 : i32
    %c0_i32_0 = arith.constant 0 : i32
    %c0_i32_1 = arith.constant 0 : i32
    return %arg0, %c0_i32, %c0_i32_0 : i32, i32, i32
  }
}

</mosaic_0001>

<bundles_post_ra>
// kernel: tpu_custom_call.1
= control target key start
LH: loop header
LB: loop body
LE: loop exit
PB: predicated region body
PF: predicated region fallthrough
CT: control target
= control target key end

     0   :  { %8 = vsyncpa [#allocation3], 0  ;;  %s258_s0 = inlined_call_operand.hbm [shape: f32[2,2,128], index: 0, kind: input, shape index: {}]   ;;  %s259_s1 = inlined_call_operand.hbm [shape: f32[2,1,128], index: 1, kind: output, shape index: {0}]   ;;  %s260_s2 = inlined_call_operand.hbm [shape: f32[2,1,128], index: 2, kind: output, shape index: {1}]  }
   0x1   :  { %9 = vsyncpa [#allocation4], 0 }
   0x2   :  { %10 = vsyncpa [#allocation7], 0  ;;  %s192_s9 = smov [#allocation2]   ;;  %s120_s13 = scalar_lea.hbm %s258_s0, 64 }
   0x3   :  { %s16_s10 = sshll.u32 %s192_s9, 4  ;;  %p121_p0 = scmp.ne.s32.totalorder %s258_s0, %s120_s13  ;;  %s17_s10 = int_to_ptr.vmem [resolvable:$true] %s16_s10 }
   0x4   :  { %p124_p1 = scmp.lt.u32.totalorder %s120_s13, %s258_s0 }
   0x6   :  { %p126_p2 = pnand %p124_p1, %p121_p0 }
   0x8   :  { %129 = shalt.err (!%p126_p2)
}
   0x9   :  { %s130_s18 = scalar_lea.vmem %s17_s10, 64  ;;  %p135_p4 = scmp.lt.s32.totalorder %s17_s10, %s17_s10 }
   0xa   :  { %p131_p3 = scmp.ne.s32.totalorder %s17_s10, %s130_s18  ;;  %p136_p5 = scmp.lt.s32.totalorder %s130_s18, %s130_s18 }
   0xc   :  { %p137_p6 = por %p136_p5, %p135_p4 }
   0xe   :  { %p138_p7 = pnand %p137_p6, %p131_p3 }
  0x10   :  { %141 = shalt.err (!%p138_p7)
}
  0x11   :  { %s193_s19 = smov 32   ;;  %s194_s20 = smov 2  }
  0x12   :  { %22 = dma.hbm_to_vmem [thread:$0]  %s258_s0, 64, %s17_s10, [#allocation3], %s193_s19, %s193_s19, %s194_s20  }
  0x13   :  { %186 = dma.done.wait [#allocation3], 64  }
  0x14   :  { %187 = vsyncadd [#allocation3], 4294967232  ;;  %v195_v0 = vmov 0.0   ;;  %vm38_vm0 = vcmask 1041408   ;;  %v34_v1 = vld [vmem:[#allocation2] sm:$0x3] }
  0x15   :  { %30 = vst [vmem:[#allocation5] sm:$0x1] %v195_v0  ;;  %31 = vst [vmem:[#allocation5 + $0x1] sm:$0x1] %v195_v0  ;;  %v35_v2 = vld [vmem:[#allocation2 + $0x2] sm:$0x3]  ;;  %v59_v5 = vmul.f32 %v34_v1, %v34_v1 }
  0x16   :  { %32 = vst [vmem:[#allocation6] sm:$0x1] %v195_v0  ;;  %33 = vst [vmem:[#allocation6 + $0x1] sm:$0x1] %v195_v0  ;;  %v39_v3 = vsel %vm38_vm0, %v34_v1, 0.0  ;;  %v46_v4 = vsel %vm38_vm0, %v35_v2, 0.0  ;;  %v60_v6 = vmul.f32 %v35_v2, %v35_v2 }
  0x17   :  { %v40_v7 = vrot.slane %v39_v3, 4  ;;  %v47_v8 = vrot.slane %v46_v4, 4  ;;  %v61_v9 = vsel %vm38_vm0, %v59_v5, 0.0  ;;  %s196_s0 = smov [#allocation5]   ;;  %s197_s24 = smov [#allocation6]  }
  0x18   :  { %v68_v10 = vsel %vm38_vm0, %v60_v6, 0.0  ;;  %v62_v13 = vrot.slane %v61_v9, 4  ;;  %s84_s23 = sshll.u32 %s196_s0, 4  ;;  %s96_s25 = sshll.u32 %s197_s24, 4  ;;  %s85_s23 = int_to_ptr.vmem [resolvable:$true] %s84_s23  ;;  %s227_s25 = int_to_ptr.vmem [resolvable:$true] %s96_s25 }
  0x19   :  { %v41_v11 = vadd.f32 %v40_v7, %v39_v3  ;;  %v48_v12 = vadd.f32 %v47_v8, %v46_v4  ;;  %v69_v14 = vrot.slane %v68_v10, 4  ;;  %s142_s26 = scalar_lea.vmem %s85_s23, 32  ;;  %p147_p9 = scmp.lt.s32.totalorder %s85_s23, %s85_s23 }
  0x1a   :  { %v63_v17 = vadd.f32 %v62_v13, %v61_v9  ;;  %p143_p8 = scmp.ne.s32.totalorder %s85_s23, %s142_s26  ;;  %p148_p10 = scmp.lt.s32.totalorder %s142_s26, %s142_s26 }
  0x1b   :  { %v42_v15 = vrot.slane %v41_v11, 2  ;;  %v49_v16 = vrot.slane %v48_v12, 2  ;;  %v70_v18 = vadd.f32 %v69_v14, %v68_v10 }
  0x1c   :  { %v64_v21 = vrot.slane %v63_v17, 2  ;;  %v36_v27 = vld [vmem:[#allocation5] sm:$0x1]  ;;  %v37_v28 = vld [vmem:[#allocation5 + $0x1] sm:$0x1]  ;;  %p149_p11 = por %p148_p10, %p147_p9 }
  0x1d   :  { %v43_v19 = vadd.f32 %v42_v15, %v41_v11  ;;  %v50_v20 = vadd.f32 %v49_v16, %v48_v12  ;;  %v71_v22 = vrot.slane %v70_v18, 2  ;;  %v57_v33 = vld [vmem:[#allocation6] sm:$0x1]  ;;  %v58_v34 = vld [vmem:[#allocation6 + $0x1] sm:$0x1] }
  0x1e   :  { %v65_v25 = vadd.f32 %v64_v21, %v63_v17  ;;  %p150_p12 = pnand %p149_p11, %p143_p8 }
  0x1f   :  { %v44_v23 = vrot.slane %v43_v19, 1  ;;  %v51_v24 = vrot.slane %v50_v20, 1  ;;  %v72_v26 = vadd.f32 %v71_v22, %v70_v18 }
  0x20   :  { %v66_v31 = vrot.slane %v65_v25, 1 }
  0x21   :  { %v45_v29 = vadd.f32 %v44_v23, %v43_v19  ;;  %v52_v30 = vadd.f32 %v51_v24, %v50_v20  ;;  %v73_v32 = vrot.slane %v72_v26, 1 }
  0x22   :  { %v67_v37 = vadd.f32 %v66_v31, %v65_v25 }
  0x23   :  { %v53_v35 = vadd.f32 %v45_v29, %v36_v27  ;;  %v54_v36 = vadd.f32 %v52_v30, %v37_v28  ;;  %v74_v38 = vadd.f32 %v73_v32, %v72_v26 }
  0x24   :  { %v75_v39 = vadd.f32 %v67_v37, %v57_v33 }
  0x25   :  { %55 = vst [vmem:[#allocation5] sm:$0x1] %v53_v35  ;;  %56 = vst [vmem:[#allocation5 + $0x1] sm:$0x1] %v54_v36  ;;  %v76_v40 = vadd.f32 %v74_v38, %v58_v34 }
  0x26   :  { %153 = shalt.err (!%p150_p12)
}
  0x27   :  { %s154_s29 = scalar_lea.hbm %s259_s1, 32 }
  0x28   :  { %p155_p13 = scmp.ne.s32.totalorder %s259_s1, %s154_s29  ;;  %p158_p0 = scmp.lt.u32.totalorder %s154_s29, %s259_s1 }
  0x2a   :  { %p160_p1 = pnand %p158_p0, %p155_p13 }
  0x2c   :  { %163 = shalt.err (!%p160_p1)
}
  0x2d   :  { %s198_s6 = smov 16   ;;  %s199_s7 = smov 1   ;;  %77 = vst [vmem:[#allocation6] sm:$0x1] %v75_v39  ;;  %78 = vst [vmem:[#allocation6 + $0x1] sm:$0x1] %v76_v40 }
  0x2e   :  { %90 = dma.vmem_to_hbm [thread:$0]  %s85_s23, 32, %s259_s1, [#allocation4], %s198_s6, %s198_s6, %s199_s7  }
  0x2f   :  { %s164_s10 = scalar_lea.vmem %s227_s25, 32  ;;  %p169_p3 = scmp.lt.s32.totalorder %s227_s25, %s227_s25 }
  0x30   :  { %p165_p2 = scmp.ne.s32.totalorder %s227_s25, %s164_s10  ;;  %p170_p4 = scmp.lt.s32.totalorder %s164_s10, %s164_s10 }
  0x32   :  { %p171_p5 = por %p170_p4, %p169_p3 }
  0x34   :  { %p172_p6 = pnand %p171_p5, %p165_p2 }
  0x36   :  { %175 = shalt.err (!%p172_p6)
}
  0x37   :  { %s176_s13 = scalar_lea.hbm %s260_s2, 32 }
  0x38   :  { %p177_p7 = scmp.ne.s32.totalorder %s260_s2, %s176_s13  ;;  %p180_p8 = scmp.lt.u32.totalorder %s176_s13, %s260_s2 }
  0x3a   :  { %p182_p9 = pnand %p180_p8, %p177_p7 }
  0x3c   :  { %185 = shalt.err (!%p182_p9)
}
  0x3d   :  { %102 = dma.vmem_to_hbm [thread:$0]  %s227_s25, 32, %s260_s2, [#allocation7], %s198_s6, %s198_s6, %s199_s7  }
  0x3e   :  { %188 = dma.done.wait [#allocation4], 32  }
  0x3f   :  { %189 = vsyncadd [#allocation4], 4294967264 }
  0x40   :  { %190 = dma.done.wait [#allocation7], 32  }
  0x41   :  { %191 = vsyncadd [#allocation7], 4294967264 }
  0x42   :  { %109 = vsyncpa [#allocation3], 1 }
  0x43   :  { %110 = vsyncpa [#allocation4], 1 }
  0x44   :  { %111 = vsyncpa [#allocation7], 1 }

</bundles_post_ra>
